<compile_context>
chip_gen: v7x
topology: tpu7x:2x2x1
jax: 0.10.0
libtpu: 0.0.40
codegen_flags: <defaults>
</compile_context>

<pallas_src>
import functools

import jax
import jax.numpy as jnp
from jax import lax
from jax.experimental import pallas as pl
from jax.experimental.pallas import tpu as pltpu


def _round_up(x, m):
    return (x + m - 1) // m * m


# -----------------------------------------------------------------------------
# Path 1: HBM-resident table + pipelined per-row DMA gather (general path).
# -----------------------------------------------------------------------------
def _gather_kernel(ids_ref, emb_hbm, out_ref, rows, sems, *,
                   scale, tile, n_token, window):
    """Gather `tile` embedding rows from an HBM table via windowed row DMAs.

    ids_ref : (N_pad,) int32 in SMEM (scalar-prefetched token ids)
    emb_hbm : (n_token, d_model) table, left in HBM (pl.ANY)
    out_ref : (tile, d_model) output tile in VMEM
    rows    : (tile, d_model) VMEM scratch (DMA destination)
    sems    : (window,) DMA semaphores (bounds outstanding copies)
    """
    base = pl.program_id(0) * tile

    def issue(i):
        # Clamp ids so a bad/padded id can never index HBM out of bounds.
        # (PyTorch nn.Embedding raises on OOB ids; here they map to a clamped
        #  row.  Padded rows use id 0 and are sliced off by the wrapper.)
        tok = ids_ref[base + i]
        tok = jnp.minimum(jnp.maximum(tok, 0), n_token - 1)
        pltpu.make_async_copy(
            emb_hbm.at[pl.ds(tok, 1), :],
            rows.at[pl.ds(i, 1), :],
            sems.at[i % window],
        ).start()

    # Prime up to `window` outstanding row DMAs.
    for i in range(min(window, tile)):
        issue(i)

    def body(j, carry):
        # Wait for row j, then reuse its semaphore slot for row j + window.
        pltpu.make_async_copy(
            emb_hbm.at[pl.ds(0, 1), :],          # same shape as the real copy
            rows.at[pl.ds(j, 1), :],
            sems.at[j % window],
        ).wait()

        @pl.when(j + window < tile)
        def _():
            issue(j + window)

        return carry

    lax.fori_loop(0, tile, body, 0)

    # Single wide, lane-dense store of the scaled tile.
    out_ref[...] = (rows[...] * scale).astype(out_ref.dtype)


def _token_embedding_gather(flat_ids, emb_table):
    n_token, d_model = emb_table.shape
    scale = float(d_model) ** 0.5
    N = flat_ids.shape[0]

    itemsize = jnp.dtype(emb_table.dtype).itemsize
    sub = {4: 8, 2: 16, 1: 32}.get(itemsize, 8)
    # Tokens per grid step: 512 amortizes the ~600-cycle per-step overhead on
    # v5e/v6e while VMEM use stays tiny (2x (T, d_model) out bufs + 1 scratch).
    T = min(512, _round_up(N, sub))
    N_pad = _round_up(N, T)

    ids = flat_ids.astype(jnp.int32)
    if N_pad != N:
        ids = jnp.pad(ids, (0, N_pad - N))   # pad with id 0 (valid, sliced off)

    window = 8   # outstanding row DMAs per grid step

    kernel = functools.partial(_gather_kernel, scale=scale, tile=T,
                               n_token=n_token, window=window)

    out = pl.pallas_call(
        kernel,
        out_shape=jax.ShapeDtypeStruct((N_pad, d_model), emb_table.dtype),
        grid_spec=pltpu.PrefetchScalarGridSpec(
            num_scalar_prefetch=1,                        # token ids -> SMEM
            grid=(N_pad // T,),
            in_specs=[pl.BlockSpec(memory_space=pl.ANY)],  # table stays in HBM
            out_specs=pl.BlockSpec((T, d_model), lambda i, ids: (i, 0)),
            scratch_shapes=[
                pltpu.VMEM((T, d_model), emb_table.dtype),
                pltpu.SemaphoreType.DMA((window,)),
            ]),
        # TODO(synk): on v7x switch to (pltpu.CORE_PARALLEL,) to shard the
        # token-tile axis across both TensorCores; "parallel" is codegen-
        # neutral on single-TC v5e/v6e.
        compiler_params=pltpu.CompilerParams(
            dimension_semantics=("parallel",)),
    )(ids, emb_table)

    return out[:N]


# -----------------------------------------------------------------------------
# Path 2: tiny-vocab VMEM-resident table + one-hot MXU gather.
# -----------------------------------------------------------------------------
def _onehot_kernel(tok_ref, emb_ref, out_ref, *, scale, n_token, precision):
    ids = tok_ref[...]                                               # (T, 1)
    col = lax.broadcasted_iota(jnp.int32, (ids.shape[0], n_token), 1)
    # Note: out-of-range ids produce an all-zero row here (nn.Embedding raises).
    one_hot = (ids == col).astype(emb_ref.dtype)                     # (T, V)
    rows = jnp.dot(one_hot, emb_ref[...],
                   preferred_element_type=jnp.float32,
                   precision=precision)                              # (T, D)
    out_ref[...] = (rows * scale).astype(out_ref.dtype)


def _token_embedding_resident(flat_ids, emb_table):
    n_token, d_model = emb_table.shape
    scale = float(d_model) ** 0.5
    N = flat_ids.shape[0]

    itemsize = jnp.dtype(emb_table.dtype).itemsize
    sub = {4: 8, 2: 16, 1: 32}.get(itemsize, 8)
    T = min(256, _round_up(N, sub))     # keep the (T, n_token) one-hot small
    N_pad = _round_up(N, T)

    ids = flat_ids.astype(jnp.int32)
    if N_pad != N:
        ids = jnp.pad(ids, (0, N_pad - N))
    tok2d = ids.reshape(N_pad, 1)

    # HIGHEST keeps f32 table values exact through the MXU; <=16-bit tables are
    # exact in a single DEFAULT pass (and ~6x fewer MXU passes).
    precision = (lax.Precision.HIGHEST if itemsize >= 4
                 else lax.Precision.DEFAULT)

    table_bytes = n_token * d_model * itemsize
    # Table (double-buffered by the pipeline) + id/out tiles + headroom.
    vmem_limit = int(2 * table_bytes + 4 * T * d_model * itemsize + (8 << 20))

    out = pl.pallas_call(
        functools.partial(_onehot_kernel, scale=scale, n_token=n_token,
                          precision=precision),
        out_shape=jax.ShapeDtypeStruct((N_pad, d_model), emb_table.dtype),
        grid_spec=pltpu.PrefetchScalarGridSpec(
            num_scalar_prefetch=0,
            grid=(N_pad // T,),
            in_specs=[
                pl.BlockSpec((T, 1), lambda i: (i, 0)),
                pl.BlockSpec((n_token, d_model), lambda i: (0, 0)),   # resident
            ],
            out_specs=pl.BlockSpec((T, d_model), lambda i: (i, 0)),
        ),
        compiler_params=pltpu.CompilerParams(
            dimension_semantics=("parallel",),
            vmem_limit_bytes=vmem_limit),
    )(tok2d, emb_table)

    return out[:N]


# -----------------------------------------------------------------------------
# Public wrapper (matches TokenEmbedding.forward semantics).
# -----------------------------------------------------------------------------
_RESIDENT_TABLE_MAX_BYTES = 2 << 20   # resident path only for trivially small tables


def token_embedding(tokens, emb_table, *, force_gather=False):
    """tokens: (B, S) int; emb_table: (n_token, d_model). Returns (B, S, d_model)."""
    n_token, d_model = emb_table.shape
    B, S = tokens.shape
    flat = tokens.reshape(B * S)

    table_bytes = n_token * d_model * jnp.dtype(emb_table.dtype).itemsize
    use_resident = (not force_gather
                    and table_bytes <= _RESIDENT_TABLE_MAX_BYTES
                    and n_token <= 2048)

    if use_resident:
        out = _token_embedding_resident(flat, emb_table)
    else:
        out = _token_embedding_gather(flat, emb_table)
    return out.reshape(B, S, d_model)


if __name__ == "__main__":
    key = jax.random.PRNGKey(0)
    k_tok, k_emb = jax.random.split(key)

    n_token, d_model = 64, 128
    batch, seq = 2, 8

    tokens = jax.random.randint(k_tok, (batch, seq), minval=0, maxval=n_token,
                                dtype=jnp.int32)
    # nn.Embedding default init ~ N(0, 1); deterministic synthetic weights.
    emb_table = jax.random.normal(k_emb, (n_token, d_model), dtype=jnp.float32)

    # Pure-JAX reference of the forward semantics.
    ref = jnp.take(emb_table, tokens, axis=0) * (d_model ** 0.5)

    # Tiny table -> resident (one-hot MXU) path.
    out_resident = token_embedding(tokens, emb_table)
    # Also force the general HBM-table DMA-gather path.
    out_gather = token_embedding(tokens, emb_table, force_gather=True)
    jax.block_until_ready((out_resident, out_gather))

    assert out_resident.shape == (batch, seq, d_model)
    assert out_gather.shape == (batch, seq, d_model)
    assert jnp.allclose(out_resident, ref, atol=1e-5, rtol=1e-5)
    assert jnp.allclose(out_gather, ref, atol=1e-5, rtol=1e-5)

    print("KERNEL_OK")
</pallas_src>

<mosaic_0001>
module attributes {stable_mosaic.version = 11 : i64} {
  func.func @_onehot_kernel(%arg0: i32, %arg1: memref<16x1xi32, #tpu.memory_space<vmem>>, %arg2: memref<64x128xf32, #tpu.memory_space<vmem>>, %arg3: memref<16x128xf32, #tpu.memory_space<vmem>>) attributes {dimension_semantics = [#tpu.dimension_semantics<parallel>], iteration_bounds = array<i64: 1>, scalar_prefetch = 0 : i64, scratch_operands = 0 : i64, tpu.core_type = #tpu.core_type<tc>, window_params = [{transform_indices = @transform_0, window_bounds = array<i64: 16, 1>}, {pipeline_mode = #tpu.pipeline_mode<synchronous>, transform_indices = @transform_1, window_bounds = array<i64: 64, 128>}, {transform_indices = @transform_2, window_bounds = array<i64: 16, 128>}]} {
    %c0 = arith.constant 0 : index
    %c0_0 = arith.constant 0 : index
    %0 = vector.load %arg1[%c0, %c0_0] : memref<16x1xi32, #tpu.memory_space<vmem>>, vector<16x1xi32>
    %1 = tpu.iota {dimensions = array<i32: 1>} : vector<16x64xi32>
    %2 = vector.broadcast %0 : vector<16x1xi32> to vector<16x64xi32>
    %3 = arith.cmpi eq, %2, %1 : vector<16x64xi32>
    %4 = arith.extui %3 : vector<16x64xi1> to vector<16x64xi32>
    %5 = arith.sitofp %4 : vector<16x64xi32> to vector<16x64xf32>
    %c0_1 = arith.constant 0 : index
    %c0_2 = arith.constant 0 : index
    %6 = vector.load %arg2[%c0_1, %c0_2] : memref<64x128xf32, #tpu.memory_space<vmem>>, vector<64x128xf32>
    %cst = arith.constant dense<0.000000e+00> : vector<16x128xf32>
    %7 = tpu.matmul %5, %6, %cst {dimension_numbers = #tpu.dot_dimension_numbers<[1], [0], [0], [1], [0, 0, 1, 1], [], []>, precision = #tpu.contract_precision<fp32>} : vector<16x64xf32>, vector<64x128xf32>, vector<16x128xf32> -> vector<16x128xf32>
    %cst_3 = arith.constant 11.3137083 : f32
    %8 = vector.broadcast %cst_3 : f32 to vector<16x128xf32>
    %9 = arith.mulf %7, %8 : vector<16x128xf32>
    %c0_4 = arith.constant 0 : index
    %c0_5 = arith.constant 0 : index
    %10 = vector.load %arg3[%c0_4, %c0_5] : memref<16x128xf32, #tpu.memory_space<vmem>>, vector<16x128xf32>
    tpu.vector_store %arg3[%c0_4, %c0_5], %9 {strides = array<i32>} : memref<16x128xf32, #tpu.memory_space<vmem>>, vector<16x128xf32>,
    return
  }
  func.func @transform_0(%arg0: i32) -> (i32, i32) {
    %c0_i32 = arith.constant 0 : i32
    %c0_i32_0 = arith.constant 0 : i32
    return %arg0, %c0_i32 : i32, i32
  }
  func.func @transform_1(%arg0: i32) -> (i32, i32) {
    %c0_i32 = arith.constant 0 : i32
    %c0_i32_0 = arith.constant 0 : i32
    %c0_i32_1 = arith.constant 0 : i32
    return %c0_i32, %c0_i32_0 : i32, i32
  }
  func.func @transform_2(%arg0: i32) -> (i32, i32) {
    %c0_i32 = arith.constant 0 : i32
    %c0_i32_0 = arith.constant 0 : i32
    return %arg0, %c0_i32 : i32, i32
  }
}

</mosaic_0001>

<bundles_post_ra>
// kernel: tpu_custom_call.1
= control target key start
LH: loop header
LB: loop body
LE: loop exit
PB: predicated region body
PF: predicated region fallthrough
CT: control target
= control target key end

     0   :  { %7 = vsyncpa [#allocation3], 0  ;;  %s1102_s0 = inlined_call_operand.vmem [shape: s32[16,1], index: 0, kind: input, shape index: {}]   ;;  %s1103_s1 = inlined_call_operand.hbm [shape: f32[64,128], index: 1, kind: input, shape index: {}]   ;;  %s1104_s2 = inlined_call_operand.hbm [shape: f32[16,128], index: 2, kind: output, shape index: {}]  }
   0x1   :  { %8 = vsyncpa [#allocation4], 0  ;;  %s1001_s9 = smov [#allocation2]   ;;  %s953_s13 = scalar_lea.hbm %s1103_s1, 1024 }
   0x2   :  { %s16_s10 = sshll.u32 %s1001_s9, 4  ;;  %p954_p0 = scmp.ne.s32.totalorder %s1103_s1, %s953_s13  ;;  %s17_s10 = int_to_ptr.vmem [resolvable:$true] %s16_s10 }
   0x3   :  { %p957_p1 = scmp.lt.u32.totalorder %s953_s13, %s1103_s1 }
   0x5   :  { %p959_p2 = pnand %p957_p1, %p954_p0 }
   0x7   :  { %962 = shalt.err (!%p959_p2)
}
   0x8   :  { %s963_s18 = scalar_lea.vmem %s17_s10, 1024  ;;  %p968_p4 = scmp.lt.s32.totalorder %s17_s10, %s17_s10 }
   0x9   :  { %p964_p3 = scmp.ne.s32.totalorder %s17_s10, %s963_s18  ;;  %p969_p5 = scmp.lt.s32.totalorder %s963_s18, %s963_s18 }
   0xb   :  { %p970_p6 = por %p969_p5, %p968_p4 }
   0xd   :  { %p971_p7 = pnand %p970_p6, %p964_p3 }
   0xf   :  { %974 = shalt.err (!%p971_p7)
}
  0x10   :  { %s1002_s19 = smov 128   ;;  %s1003_s20 = smov 8  }
  0x11   :  { %22 = dma.hbm_to_vmem [thread:$0]  %s1103_s1, 1024, %s17_s10, [#allocation3], %s1002_s19, %s1002_s19, %s1003_s20  }
  0x12   :  { %997 = dma.done.wait [#allocation3], 1024  }
  0x13   :  { %998 = vsyncadd [#allocation3], 4294966272  ;;  %v1004_v0 = vmov 0   ;;  %v26_v1 = vld [vmem:[%s1102_s0] sm:$0xff]  ;;  %v43_v3 = vld [vmem:[#allocation2 + $0x8] sm:$0xff]  ;;  %vm50_vm0 = vcmask 523264  }
  0x14   :  { %952 = vset.pattern.permute.xlu0 %v1004_v0  ;;  %v42_v2 = vld [vmem:[#allocation2] sm:$0xff]  ;;  %v44_v5 = vld [vmem:[#allocation2 + $0x10] sm:$0xff]  ;;  %v45_v6 = vld [vmem:[#allocation2 + $0x18] sm:$0xff]  ;;  %v61_v8 = vand.u32 4294901760, %v43_v3 }
  0x15   :  { %31 = vperm.xlu0 %952, %v26_v1   ;;  %v58_v4 = vand.u32 4294901760, %v42_v2  ;;  %v27_v7 = vld [vmem:[%s1102_s0 + $0x8] sm:$0xff]  ;;  %v64_v9 = vand.u32 4294901760, %v44_v5  ;;  %v67_v10 = vand.u32 4294901760, %v45_v6  ;;  %v46_v11 = vld [vmem:[#allocation2 + $0x20] sm:$0xff]  ;;  %v48_v17 = vld [vmem:[#allocation2 + $0x30] sm:$0xff] }
  0x16   :  { %v47_v12 = vld [vmem:[#allocation2 + $0x28] sm:$0xff]  ;;  %v70_v15 = vand.u32 4294901760, %v46_v11  ;;  %v49_v18 = vld [vmem:[#allocation2 + $0x38] sm:$0xff]  ;;  %v159_v20 = vsub.f32 %v43_v3, %v61_v8  ;;  %v76_v21 = vand.u32 4294901760, %v48_v17  ;;  %v28_v3 = vlaneseq  ;;  %s1006_s0 = smov [#allocation5]  }
  0x17   :  { %v1043_v13 = vpack.c.bf16 %v61_v8, %v58_v4  ;;  %v1045_v14 = vpack.c.bf16 %v67_v10, %v64_v9  ;;  %v73_v16 = vand.u32 4294901760, %v47_v12  ;;  %v152_v19 = vsub.f32 %v42_v2, %v58_v4  ;;  %s646_s1 = sshll.u32 %s1006_s0, 4  ;;  %s647_s1 = int_to_ptr.vmem [resolvable:$true] %s646_s1 }
  0x18   :  { %v79_v22 = vand.u32 4294901760, %v49_v18  ;;  %v160_v24 = vand.u32 4294901760, %v159_v20  ;;  %v166_v28 = vsub.f32 %v44_v5, %v64_v9  ;;  %v173_v29 = vsub.f32 %v45_v6, %v67_v10  ;;  %s975_s27 = scalar_lea.vmem %s647_s1, 256  ;;  %p980_p9 = scmp.lt.s32.totalorder %s647_s1, %s647_s1 }
  0x19   :  { %34 = vperm.xlu0 %952, %v27_v7   ;;  %889 = vmatprep.subr.bf16.mxu0 %v1043_v13  ;;  %v153_v23 = vand.u32 4294901760, %v152_v19  ;;  %v1053_v25 = vpack.c.bf16 %v73_v16, %v70_v15  ;;  %v180_v38 = vsub.f32 %v46_v11, %v70_v15  ;;  %v187_v39 = vsub.f32 %v47_v12, %v73_v16  ;;  %p976_p8 = scmp.ne.s32.totalorder %s647_s1, %s975_s27  ;;  %p981_p10 = scmp.lt.s32.totalorder %s975_s27, %s975_s27 }
  0x1a   :  { %841 = vmatprep.subr.bf16.mxu1 %v1043_v13  ;;  %891 = vmatpush3.bf16.msra.mxu0 %v1043_v13  ;;  %v161_v27 = vsub.f32 %v159_v20, %v160_v24  ;;  %v1057_v30 = vpack.c.bf16 %v79_v22, %v76_v21  ;;  %v167_v33 = vand.u32 4294901760, %v166_v28  ;;  %v174_v34 = vand.u32 4294901760, %v173_v29 }
  0x1b   :  { %843 = vmatpush3.bf16.msra.mxu1 %v1043_v13  ;;  %893 = vmatprep.subr.bf16.mxu0 %v1045_v14  ;;  %v154_v26 = vsub.f32 %v152_v19, %v153_v23  ;;  %v904_v40 = vpack.c.bf16 %v160_v24, %v153_v23  ;;  %v181_v44 = vand.u32 4294901760, %v180_v38  ;;  %v188_v45 = vand.u32 4294901760, %v187_v39  ;;  %p982_p11 = por %p981_p10, %p980_p9 }
  0x1c   :  { %845 = vmatprep.subr.bf16.mxu1 %v1045_v14  ;;  %v162_v32 = vand.u32 4294901760, %v161_v27  ;;  %v1061_v35 = vpack.c.bf16 %v174_v34, %v167_v33  ;;  %v168_v36 = vsub.f32 %v166_v28, %v167_v33  ;;  %v175_v37 = vsub.f32 %v173_v29, %v174_v34 }
  0x1d   :  { %v155_v31 = vand.u32 4294901760, %v154_v26  ;;  %v194_v47 = vsub.f32 %v48_v17, %v76_v21  ;;  %v201_v48 = vsub.f32 %v49_v18, %v79_v22  ;;  %v912_v49 = vpack.c.bf16 %v188_v45, %v181_v44  ;;  %p983_p12 = pnand %p982_p11, %p976_p8 }
  0x1e   :  { %895 = vmatpush3.bf16.msra.mxu0 %v1045_v14  ;;  %v169_v42 = vand.u32 4294901760, %v168_v36  ;;  %v176_v43 = vand.u32 4294901760, %v175_v37  ;;  %v182_v50 = vsub.f32 %v180_v38, %v181_v44  ;;  %v189_v51 = vsub.f32 %v187_v39, %v188_v45 }
  0x1f   :  { %847 = vmatpush3.bf16.msra.mxu1 %v1045_v14  ;;  %897 = vmatprep.subr.bf16.mxu0 %v1053_v25  ;;  %v856_v41 = vpack.c.bf16 %v162_v32, %v155_v31  ;;  %v195_v52 = vand.u32 4294901760, %v194_v47  ;;  %v202_v53 = vand.u32 4294901760, %v201_v48  ;;  %v872_v63 = vpack.c.bf16 %v159_v20, %v152_v19 }
  0x20   :  { %849 = vmatprep.subr.bf16.mxu1 %v1053_v25  ;;  %v860_v46 = vpack.c.bf16 %v176_v43, %v169_v42  ;;  %v183_v54 = vand.u32 4294901760, %v182_v50  ;;  %v190_v55 = vand.u32 4294901760, %v189_v51  ;;  %v876_v0 = vpack.c.bf16 %v173_v29, %v166_v28 }
  0x21   :  { %v916_v56 = vpack.c.bf16 %v202_v53, %v195_v52  ;;  %v196_v57 = vsub.f32 %v194_v47, %v195_v52  ;;  %v203_v58 = vsub.f32 %v201_v48, %v202_v53  ;;  %v880_v1 = vpack.c.bf16 %v187_v39, %v180_v38 }
  0x22   :  { %899 = vmatpush3.bf16.msra.mxu0 %v1053_v25  ;;  %v864_v59 = vpack.c.bf16 %v190_v55, %v183_v54  ;;  %v884_v2 = vpack.c.bf16 %v201_v48, %v194_v47  ;;  %v29_v4 = vand.u32 127, %v28_v3  ;;  %v1005_v6 = vmov 0.0  }
  0x23   :  { %851 = vmatpush3.bf16.msra.mxu1 %v1053_v25  ;;  %901 = vmatprep.subr.bf16.mxu0 %v1057_v30  ;;  %v197_v60 = vand.u32 4294901760, %v196_v57  ;;  %v204_v61 = vand.u32 4294901760, %v203_v58 }
  0x24   :  { %853 = vmatprep.subr.bf16.mxu1 %v1057_v30 }
  0x25   :  { %v868_v62 = vpack.c.bf16 %v204_v61, %v197_v60 }
  0x26   :  { %903 = vmatpush3.bf16.msra.mxu0 %v1057_v30 }
  0x27   :  { %855 = vmatpush3.bf16.msra.mxu1 %v1057_v30  ;;  %905 = vmatprep.subr.bf16.mxu0 %v904_v40 }
  0x28   :  { %857 = vmatprep.subr.bf16.mxu1 %v856_v41 }
  0x94   :  { %v32_v5 = vpop.permute.xlu0 %31 }
  0x95   :  { %vm36_vm1 = vcmp.eq.s32.totalorder %v32_v5, %v29_v4 }
  0x96   :  { %v658_v7 = vsel %vm36_vm1, 1.0, %v1005_v6 }
  0x97   :  { %v52_v8 = vsel %vm50_vm0, %v658_v7, 0 }
  0x98   :  { %v131_v9 = vsub.f32 %v52_v8, %v52_v8  ;;  %v35_v10 = vpop.permute.xlu0 %34 }
  0x99   :  { %vm37_vm2 = vcmp.eq.s32.totalorder %v35_v10, %v29_v4 }
  0x9a   :  { %v659_v11 = vsel %vm37_vm2, 1.0, %v1005_v6  ;;  %v132_v12 = vand.u32 4294901760, %v131_v9 }
  0x9b   :  { %v55_v15 = vsel %vm50_vm0, %v659_v11, 0 }
  0x9c   :  { %v141_v16 = vsub.f32 %v55_v15, %v55_v15  ;;  %799 = vmatprep.mubr.f32.mxu0 %v132_v12  ;;  %v133_v17 = vsub.f32 %v131_v9, %v132_v12 }
  0x9e   :  { %v134_v18 = vand.u32 4294901760, %v133_v17  ;;  %v142_v19 = vand.u32 4294901760, %v141_v16 }
  0xa0   :  { %742 = vmatprep.mubr.f32.mxu1 %v134_v18  ;;  %800 = vmatmul.mubr.f32.vlgmr.msra.gmra.mrb[0].mxu0 %v142_v19  ;;  %v143_v20 = vsub.f32 %v141_v16, %v142_v19 }
  0xa1   :  { %907 = vmatpush3.bf16.msra.mxu0 %v904_v40  ;;  %818 = vmatprep.mubr.msk.f32.mxu0 %vm50_vm0, %v658_v7 }
  0xa2   :  { %909 = vmatprep.subr.bf16.mxu0 %v1061_v35  ;;  %v144_v21 = vand.u32 4294901760, %v143_v20 }
  0xa4   :  { %743 = vmatmul.mubr.f32.vlgmr.msra.gmra.mrb[0].mxu1 %v144_v21 }
  0xa5   :  { %859 = vmatpush3.bf16.msra.mxu1 %v856_v41  ;;  %911 = vmatpush3.bf16.msra.mxu0 %v1061_v35 }
  0xa6   :  { %761 = vmatprep.mubr.msk.f32.mxu1 %vm50_vm0, %v658_v7  ;;  %861 = vmatprep.subr.bf16.mxu1 %v860_v46 }
  0xa7   :  { %913 = vmatprep.subr.bf16.mxu0 %v912_v49 }
  0xa9   :  { %863 = vmatpush3.bf16.msra.mxu1 %v860_v46  ;;  %915 = vmatpush3.bf16.msra.mxu0 %v912_v49 }
  0xaa   :  { %865 = vmatprep.subr.bf16.mxu1 %v864_v59  ;;  %917 = vmatprep.subr.bf16.mxu0 %v916_v56 }
  0xad   :  { %867 = vmatpush3.bf16.msra.mxu1 %v864_v59  ;;  %919 = vmatpush3.bf16.msra.mxu0 %v916_v56 }
  0xae   :  { %869 = vmatprep.subr.bf16.mxu1 %v868_v62  ;;  %921 = vmatprep.subr.bf16.mxu0 %v1043_v13 }
  0xb0   :  { %819 = vmatmul.mubr.msk.f32.vlgmr.msra.gmra.mrb[0].mxu0 %vm50_vm0, %v659_v11 }
  0xb1   :  { %871 = vmatpush3.bf16.msra.mxu1 %v868_v62  ;;  %923 = vmatpush3.bf16.msra.mxu0 %v1043_v13 }
  0xb2   :  { %837 = vmatprep.mubr.msk.f32.mxu0 %vm50_vm0, %v658_v7  ;;  %873 = vmatprep.subr.bf16.mxu1 %v872_v63 }
  0xb3   :  { %925 = vmatprep.subr.bf16.mxu0 %v1045_v14 }
  0xb4   :  { %762 = vmatmul.mubr.msk.f32.vlgmr.msra.gmra.mrb[0].mxu1 %vm50_vm0, %v659_v11 }
  0xb5   :  { %875 = vmatpush3.bf16.msra.mxu1 %v872_v63  ;;  %780 = vmatprep.mubr.f32.mxu1 %v131_v9 }
  0xb6   :  { %927 = vmatpush3.bf16.msra.mxu0 %v1045_v14  ;;  %877 = vmatprep.subr.bf16.mxu1 %v876_v0 }
  0xb7   :  { %929 = vmatprep.subr.bf16.mxu0 %v1053_v25 }
  0xb9   :  { %879 = vmatpush3.bf16.msra.mxu1 %v876_v0 }
  0xba   :  { %931 = vmatpush3.bf16.msra.mxu0 %v1053_v25  ;;  %881 = vmatprep.subr.bf16.mxu1 %v880_v1 }
  0xbb   :  { %933 = vmatprep.subr.bf16.mxu0 %v1057_v30 }
  0xbd   :  { %883 = vmatpush3.bf16.msra.mxu1 %v880_v1 }
  0xbe   :  { %935 = vmatpush3.bf16.msra.mxu0 %v1057_v30  ;;  %885 = vmatprep.subr.bf16.mxu1 %v884_v2 }
  0xc1   :  { %838 = vmatmul.mubr.msk.f32.vlgmr.msra.gmra.mrb[0].mxu0 %vm50_vm0, %v659_v11  ;;  %887 = vmatpush3.bf16.msra.mxu1 %v884_v2 }
  0xc4   :  { %781 = vmatmul.mubr.f32.vlgmr.msra.gmra.mrb[0].mxu1 %v141_v16 }
 0x194   :  { %v839_v13 = vpop.f32.mrb[0].mxu0 }
 0x195   :  { %v627_v22 = vpop.f32.mrb[1].mxu0 }
 0x197   :  { %v782_v14 = vpop.f32.mrb[0].mxu1 }
 0x198   :  { %v936_v23 = vadd.f32 %v839_v13, %v782_v14  ;;  %v351_v24 = vpop.f32.mrb[1].mxu1 }
 0x199   :  { %v937_v26 = vadd.f32 %v627_v22, %v351_v24 }
 0x19a   :  { %v638_v25 = vmul.f32 11.313708, %v936_v23 }
 0x19b   :  { %v637_v27 = vmul.f32 11.313708, %v937_v26 }
 0x19c   :  { %640 = vst [vmem:[#allocation5 + $0x8] sm:$0xff] %v638_v25 }
 0x19d   :  { %639 = vst [vmem:[#allocation5] sm:$0xff] %v637_v27 }
 0x19e   :  { %986 = shalt.err (!%p983_p12)
}
 0x19f   :  { %s987_s30 = scalar_lea.hbm %s1104_s2, 256 }
 0x1a0   :  { %p988_p13 = scmp.ne.s32.totalorder %s1104_s2, %s987_s30  ;;  %p991_p0 = scmp.lt.u32.totalorder %s987_s30, %s1104_s2 }
 0x1a2   :  { %p993_p1 = pnand %p991_p0, %p988_p13 }
 0x1a4   :  { %996 = shalt.err (!%p993_p1)
}
 0x1a5   :  { %652 = dma.vmem_to_hbm [thread:$0]  %s647_s1, 256, %s1104_s2, [#allocation4], %s1002_s19, %s1002_s19, %s1003_s20  }
 0x1a6   :  { %999 = dma.done.wait [#allocation4], 256  }
 0x1a7   :  { %1000 = vsyncadd [#allocation4], 4294967040 }
 0x1a8   :  { %656 = vsyncpa [#allocation3], 1 }
 0x1a9   :  { %657 = vsyncpa [#allocation4], 1 }

</bundles_post_ra>
